<compile_context>
chip_gen: v5e
topology: v5e:2x2
jax: 0.10.0
libtpu: 0.0.40
codegen_flags: <defaults>
</compile_context>

<pallas_src>
import functools

import jax
import jax.numpy as jnp
from jax.experimental import pallas as pl
from jax.experimental.pallas import tpu as pltpu


_LANES = 128           # vreg lane width; output last dim kept lane-dense at 128
_MAX_ROW_BLOCK = 1024  # 1024x128 f32 tile = 512 KiB; double-buffered in+out
                       # ~= 2 MiB VMEM -> fits every chip incl. v7x.


def _scaled_copy_kernel(x_ref, o_ref, *, mult):
    # loc = mult_t * previous_latents[-1]   (pure VPU elementwise, lane-dense)
    o_ref[...] = (x_ref[...] * mult).astype(o_ref.dtype)


def proposal_time_t(prev_latent, mult_t, scale_t):
    """time != 0 branch: loc = mult_t * prev_latent, scale = scale_t (scalar)."""
    orig_shape = prev_latent.shape
    dtype = prev_latent.dtype
    n = prev_latent.size

    # Lane-dense 2-D view: (rows, 128), rows a multiple of the row tile.
    rows = pl.cdiv(n, _LANES)
    rows8 = ((rows + 7) // 8) * 8                        # sublane multiple of 8
    row_block = min(rows8, _MAX_ROW_BLOCK)
    rows_padded = ((rows8 + row_block - 1) // row_block) * row_block
    n_padded = rows_padded * _LANES

    flat = prev_latent.reshape(-1)
    if n_padded != n:
        flat = jnp.pad(flat, (0, n_padded - n))
    x2d = flat.reshape(rows_padded, _LANES)

    kernel = functools.partial(_scaled_copy_kernel, mult=float(mult_t))
    loc2d = pl.pallas_call(
        kernel,
        out_shape=jax.ShapeDtypeStruct((rows_padded, _LANES), dtype),
        grid=(rows_padded // row_block,),
        in_specs=[pl.BlockSpec((row_block, _LANES), lambda i: (i, 0))],
        out_specs=pl.BlockSpec((row_block, _LANES), lambda i: (i, 0)),
        compiler_params=pltpu.CompilerParams(
            dimension_semantics=("parallel",)),
    )(x2d)

    loc = loc2d.reshape(-1)[:n].reshape(orig_shape)
    scale = jnp.asarray(scale_t, dtype=dtype)   # scalar, like torch Normal(scale=float)
    return loc, scale


def proposal_time_0(mu_0, scale_0, batch_size, dtype=jnp.float32):
    """time == 0 branch: pure constant broadcast -> no kernel needed."""
    mu = jnp.asarray(mu_0, dtype=dtype).reshape(1, -1)
    loc = jnp.broadcast_to(mu, (batch_size, mu.shape[-1]))
    scale = jnp.asarray(scale_0, dtype=dtype)
    return loc, scale


class BootstrapProposal:
    """JAX/Pallas port of Bootstrap_Proposal.

    __call__ returns the (loc, scale) parameters of the proposal Normal:
      time == 0 : loc (batch_size, 2),                 scale scalar
      time != 0 : loc (batch, particles, dim_latents), scale scalar
    """
    # TODO(synk): torch.distributions.Normal / aesmc.state.set_batch_shape_mode
    # have no Pallas equivalent; we return the Normal's parameter tensors.

    def __init__(self, scale_0, mu_0, scale_t, mult_t):
        self.scale_0 = float(scale_0)
        self.mu_0 = jnp.asarray(mu_0, dtype=jnp.float32)   # shape (2,)
        self.scale_t = float(scale_t)
        self.mult_t = float(mult_t)

    def __call__(self, previous_latents=None, time=None, observations=None):
        if time == 0:
            batch_size = observations[-1].shape[0]
            return proposal_time_0(self.mu_0, self.scale_0, batch_size)
        else:
            return proposal_time_t(previous_latents[-1], self.mult_t, self.scale_t)


if __name__ == "__main__":
    key = jax.random.PRNGKey(0)
    batch, particles, dim_latents, obs_dim = 2, 8, 2, 1
    k1, k2 = jax.random.split(key)

    prev_latent = jax.random.normal(k1, (batch, particles, dim_latents),
                                    dtype=jnp.float32)
    observation = jax.random.normal(k2, (batch, obs_dim), dtype=jnp.float32)

    proposal = BootstrapProposal(scale_0=1.0,
                                 mu_0=jnp.array([0.5, -0.5], dtype=jnp.float32),
                                 scale_t=0.1,
                                 mult_t=0.9)

    # time == 0 branch (pure broadcast, no kernel launch)
    loc0, scale0 = proposal(observations=[observation], time=0)
    # time != 0 branch (Pallas kernel, single lane-dense (8,128) tile)
    loct, scalet = proposal(previous_latents=[prev_latent], time=1)
    jax.block_until_ready((loc0, scale0, loct, scalet))

    # Reference checks (plain JAX semantics of the PyTorch forward).
    assert loc0.shape == (batch, 2)
    assert jnp.allclose(loc0, jnp.broadcast_to(jnp.array([0.5, -0.5]), (batch, 2)))
    assert jnp.allclose(scale0, 1.0)
    assert loct.shape == (batch, particles, dim_latents)
    assert jnp.allclose(loct, 0.9 * prev_latent, atol=1e-6)
    assert jnp.allclose(scalet, 0.1)

    # Also exercise the gridded multi-tile path (grid > 1) once.
    big = jax.random.normal(jax.random.PRNGKey(1), (16, 8192, 2), dtype=jnp.float32)
    loc_big, _ = proposal(previous_latents=[big], time=3)
    jax.block_until_ready(loc_big)
    assert loc_big.shape == big.shape
    assert jnp.allclose(loc_big, 0.9 * big, atol=1e-6)

    print("KERNEL_OK")
</pallas_src>

<mosaic_0001>
module attributes {stable_mosaic.version = 11 : i64} {
  func.func @_scaled_copy_kernel(%arg0: i32, %arg1: memref<8x128xf32, #tpu.memory_space<vmem>>, %arg2: memref<8x128xf32, #tpu.memory_space<vmem>>) attributes {dimension_semantics = [#tpu.dimension_semantics<parallel>], iteration_bounds = array<i64: 1>, scalar_prefetch = 0 : i64, scratch_operands = 0 : i64, tpu.core_type = #tpu.core_type<tc>, window_params = [{transform_indices = @transform_0, window_bounds = array<i64: 8, 128>}, {transform_indices = @transform_1, window_bounds = array<i64: 8, 128>}]} {
    %c0 = arith.constant 0 : index
    %c0_0 = arith.constant 0 : index
    %0 = vector.load %arg1[%c0, %c0_0] : memref<8x128xf32, #tpu.memory_space<vmem>>, vector<8x128xf32>
    %cst = arith.constant 0.899999976 : f32
    %1 = vector.broadcast %cst : f32 to vector<8x128xf32>
    %2 = arith.mulf %0, %1 : vector<8x128xf32>
    %c0_1 = arith.constant 0 : index
    %c0_2 = arith.constant 0 : index
    %3 = vector.load %arg2[%c0_1, %c0_2] : memref<8x128xf32, #tpu.memory_space<vmem>>, vector<8x128xf32>
    tpu.vector_store %arg2[%c0_1, %c0_2], %2 {strides = array<i32>} : memref<8x128xf32, #tpu.memory_space<vmem>>, vector<8x128xf32>,
    return
  }
  func.func @transform_0(%arg0: i32) -> (i32, i32) {
    %c0_i32 = arith.constant 0 : i32
    %c0_i32_0 = arith.constant 0 : i32
    return %arg0, %c0_i32 : i32, i32
  }
  func.func @transform_1(%arg0: i32) -> (i32, i32) {
    %c0_i32 = arith.constant 0 : i32
    %c0_i32_0 = arith.constant 0 : i32
    return %arg0, %c0_i32 : i32, i32
  }
}

</mosaic_0001>

<bundles_post_ra>
// kernel: tpu_custom_call.1
= control target key start
LH: loop header
LB: loop body
LE: loop exit
PB: predicated region body
PF: predicated region fallthrough
CT: control target
= control target key end

     0   :  { %6 = vsyncpa [#allocation3], 0  ;;  %s115_s0 = inlined_call_operand.hbm [shape: f32[8,128], index: 0, kind: input, shape index: {}]   ;;  %s116_s1 = inlined_call_operand.hbm [shape: f32[8,128], index: 1, kind: output, shape index: {}]  }
   0x1   :  { %7 = vsyncpa [#allocation4], 0  ;;  %s13_s8 = sshll.u32 %s115_s0, 4  ;;  %s97_s9 = smov [#allocation2]   ;;  %s14_s8 = int_to_ptr.hbm [resolvable:$true] %s13_s8 }
   0x2   :  { %s15_s10 = sshll.u32 %s97_s9, 4  ;;  %s16_s10 = int_to_ptr.vmem [resolvable:$true] %s15_s10 }
   0x3   :  { %18 = dma.hbm_to_vmem [thread:$0]  %s14_s8, 128, %s16_s10, [#allocation3]  }
   0x4   :  { %93 = dma.done.wait [#allocation3], 128  }
   0x5   :  { %94 = vsyncadd [#allocation3], 4294967168  ;;  %s98_s11 = smov [#allocation5]   ;;  %s33_s15 = sshll.u32 %s116_s1, 4  ;;  %v23_v0 = vld [vmem:[#allocation2] sm:$0xff]  ;;  %s34_s15 = int_to_ptr.hbm [resolvable:$true] %s33_s15 }
   0x6   :  { %s31_s12 = sshll.u32 %s98_s11, 4  ;;  %v24_v1 = vmul.f32 0.9, %v23_v0  ;;  %s32_s12 = int_to_ptr.vmem [resolvable:$true] %s31_s12 }
   0x8   :  { %25 = vst [vmem:[#allocation5] sm:$0xff] %v24_v1 }
   0x9   :  { %36 = dma.vmem_to_hbm [thread:$0]  %s32_s12, 128, %s34_s15, [#allocation4]  }
   0xa   :  { %95 = dma.done.wait [#allocation4], 128  }
   0xb   :  { %96 = vsyncadd [#allocation4], 4294967168 }
   0xc   :  { %41 = vsyncpa [#allocation3], 1 }
   0xd   :  { %42 = vsyncpa [#allocation4], 1 }

</bundles_post_ra>
